<compile_context>
chip_gen: v7x
topology: tpu7x:2x2x1
jax: 0.10.0
libtpu: 0.0.40
codegen_flags: <defaults>
</compile_context>

<pallas_src>
import math

import jax
import jax.numpy as jnp
from jax import lax
from jax.experimental import pallas as pl
from jax.experimental.pallas import tpu as pltpu

EPSILON = 1e-07


def _make_vi_kernel(dx_total, tdx, needs_col_mask):
    """Build the kernel for a (batch-tile, feature-tile) 2-D grid.

    out_ref row 0 = reconstruction log-likelihood, row 1 = KL divergence.
    The feature (Dx) axis is the inner, "arbitrary" reduction axis; acc_ref
    holds the per-row partial reconstruction sum across feature tiles.
    """

    def kernel(r_ref, x_ref, z_ref, mu_ref, lv_ref, out_ref, acc_ref):
        f32 = jnp.float32
        j = pl.program_id(1)

        @pl.when(j == 0)
        def _():
            acc_ref[...] = jnp.zeros_like(acc_ref)

        r = r_ref[...].astype(f32)
        x = x_ref[...].astype(f32)

        # Bernoulli reconstruction log-likelihood:
        #   x*log(r+eps) + (1-x)*log(1-r+eps)  ==  lB + x*(lA - lB)
        lA = jnp.log(r + EPSILON)
        lB = jnp.log(1.0 - r + EPSILON)
        recon = lB + x * (lA - lB)
        if needs_col_mask:
            # Ragged last feature tile: zero out the out-of-range columns so
            # garbage reads can't contaminate the row sums.
            col = j * tdx + lax.broadcasted_iota(jnp.int32, recon.shape, 1)
            recon = jnp.where(col < dx_total, recon, 0.0)
        acc_ref[...] += jnp.sum(recon, axis=1, keepdims=True)

        @pl.when(j == pl.num_programs(1) - 1)
        def _():
            z = z_ref[...].astype(f32)
            mu = mu_ref[...].astype(f32)
            lv = lv_ref[...].astype(f32)
            d = z - mu
            # log N(z;0,I) - log N(z;mu,exp(lv)): the +-0.5*log(2*pi) cancel, so
            #   kl = 0.5 * sum(lv + (z-mu)^2 * exp(-lv) - z^2)
            # (single EUP transcendental per latent element, one reduction).
            kl = 0.5 * jnp.sum(lv + d * d * jnp.exp(-lv) - z * z, axis=1)

            out_ref[0, :] = acc_ref[...][:, 0]
            out_ref[1, :] = kl

    return kernel


def _choose_tiles(B, Dx, Dz, rx_itemsize, z_itemsize, vmem_capacity):
    """Pick (batch_tile, feature_tile) sized from the chip's VMEM capacity."""
    # Per buffer-set budget; BlockSpec double-buffers inputs, so live footprint
    # is ~2x this.  ~32 MiB on v5e/v6e (128 MiB VMEM), ~16 MiB on v7x (64 MiB).
    budget = max(vmem_capacity // 4, 4 * 1024 * 1024)
    latent_row = 3 * Dz * z_itemsize
    full_row = 2 * Dx * rx_itemsize + latent_row + 2 * 4  # +2*4: packed f32 out

    if B <= 128:
        tb = int(B)  # single full block (full-dim rule)
    else:
        # Guarantee >=2 grid steps (both v7x TensorCores busy) and >=8 steps for
        # large B so the pipeline has DMA to overlap with compute.
        min_steps = 8 if B > 1024 else 2
        tb = min(budget // max(full_row, 1), pl.cdiv(B, min_steps), B, 4096)
        tb = max((tb // 128) * 128, 128)  # lane-aligned (output lanes = batch)

    # Feature-axis fallback: if even the minimum batch tile at full Dx width
    # exceeds the budget, tile Dx too (inner "arbitrary" reduction axis).
    tdx = int(Dx)
    if tb * full_row > budget and Dx > 256:
        per_col = 2 * rx_itemsize
        avail = budget // tb - latent_row - 2 * 4
        tdx = max((int(avail) // per_col // 128) * 128, 128)
        tdx = int(min(tdx, Dx))
    return int(tb), tdx


def variational_inference(r, x, latent, *, block_rows=None, block_cols=None,
                          vmem_limit_bytes=None):
    """JAX/Pallas equivalent of VariationalInference.forward(r, x, latent).

    latent = (z, mu, log_var), each of shape (B, Dz).
    Returns (log_likelihood, kl_divergence), each of shape (B,).
    """
    z, mu, log_var = latent
    B, Dx = r.shape
    Dz = z.shape[1]

    try:
        vmem_capacity = int(pltpu.get_tpu_info().vmem_capacity_bytes)
    except Exception:
        vmem_capacity = 64 * 1024 * 1024  # conservative (v7x per-TC) fallback

    tb_auto, tdx_auto = _choose_tiles(
        B, Dx, Dz,
        jnp.dtype(r.dtype).itemsize,
        jnp.dtype(z.dtype).itemsize,
        vmem_capacity,
    )
    tb = tb_auto if block_rows is None else int(block_rows)
    tb = min(tb, B)
    tdx = tdx_auto if block_cols is None else int(block_cols)
    tdx = min(tdx, Dx)

    if vmem_limit_bytes is None:
        # ~96 MiB on 128 MiB parts (v5e/v6e), ~48 MiB on v7x.
        vmem_limit_bytes = min(vmem_capacity * 3 // 4, 100 * 1024 * 1024)

    grid = (pl.cdiv(B, tb), pl.cdiv(Dx, tdx))
    needs_col_mask = (Dx % tdx) != 0

    in_specs = [
        pl.BlockSpec((tb, tdx), lambda i, j: (i, j)),   # r
        pl.BlockSpec((tb, tdx), lambda i, j: (i, j)),   # x
        pl.BlockSpec((tb, Dz), lambda i, j: (i, 0)),    # z   (resident across j)
        pl.BlockSpec((tb, Dz), lambda i, j: (i, 0)),    # mu
        pl.BlockSpec((tb, Dz), lambda i, j: (i, 0)),    # log_var
    ]
    # Packed lane-dense output slab: (2, B) with batch on the lane axis.
    out_spec = pl.BlockSpec((2, tb), lambda i, j: (0, i))

    rx_bytes = jnp.dtype(r.dtype).itemsize
    z_bytes = jnp.dtype(z.dtype).itemsize
    cost = pl.CostEstimate(
        flops=int(B * (5 * Dx + 9 * Dz)),
        transcendentals=int(B * (2 * Dx + Dz)),
        bytes_accessed=int(2 * B * Dx * rx_bytes + 3 * B * Dz * z_bytes + 2 * B * 4),
    )

    packed = pl.pallas_call(
        _make_vi_kernel(Dx, tdx, needs_col_mask),
        out_shape=jax.ShapeDtypeStruct((2, B), jnp.float32),
        grid=grid,
        in_specs=in_specs,
        out_specs=out_spec,
        scratch_shapes=[pltpu.VMEM((tb, 1), jnp.float32)],  # recon partial sums
        compiler_params=pltpu.CompilerParams(
            dimension_semantics=("parallel", "arbitrary"),
            vmem_limit_bytes=int(vmem_limit_bytes),
        ),
        cost_estimate=cost,
    )(r, x, z, mu, log_var)

    log_likelihood = packed[0]
    kl_divergence = packed[1]
    return log_likelihood, kl_divergence


def _reference(r, x, latent):
    """Pure-JAX mirror of the PyTorch forward (same Bernoulli reconstruction)."""
    z, mu, lv = latent
    half_log_2pi = 0.5 * math.log(2.0 * math.pi)
    ll = jnp.sum(x * jnp.log(r + EPSILON) + (1.0 - x) * jnp.log(1.0 - r + EPSILON),
                 axis=1)
    log_pz = jnp.sum(-half_log_2pi - 0.5 * z * z, axis=1)
    log_qz = jnp.sum(-half_log_2pi - 0.5 * lv - (z - mu) ** 2 / (2.0 * jnp.exp(lv)),
                     axis=1)
    return ll, log_pz - log_qz


if __name__ == "__main__":
    key = jax.random.PRNGKey(0)
    B, Dx, Dz = 256, 64, 16

    k = jax.random.split(key, 5)
    r = jax.nn.sigmoid(jax.random.normal(k[0], (B, Dx), jnp.float32))
    x = jax.random.uniform(k[1], (B, Dx), jnp.float32)
    z = jax.random.normal(k[2], (B, Dz), jnp.float32)
    mu = 0.1 * jax.random.normal(k[3], (B, Dz), jnp.float32)
    log_var = 0.1 * jax.random.normal(k[4], (B, Dz), jnp.float32)
    latent = (z, mu, log_var)

    # Auto tiling -> tb=128 here, i.e. a 2-step batch grid exercising both the
    # pipelined tiling and (on v7x) the per-core sharding.
    ll, kl = variational_inference(r, x, latent)
    jax.block_until_ready((ll, kl))

    ll_ref, kl_ref = _reference(r, x, latent)
    assert ll.shape == (B,) and kl.shape == (B,)
    assert jnp.allclose(ll, ll_ref, atol=1e-4, rtol=1e-4)
    assert jnp.allclose(kl, kl_ref, atol=1e-4, rtol=1e-4)

    print("KERNEL_OK")
</pallas_src>

<mosaic_0001>
module attributes {stable_mosaic.version = 11 : i64} {
  func.func @kernel(%arg0: i32, %arg1: i32, %arg2: memref<128x64xf32, #tpu.memory_space<vmem>>, %arg3: memref<128x64xf32, #tpu.memory_space<vmem>>, %arg4: memref<128x16xf32, #tpu.memory_space<vmem>>, %arg5: memref<128x16xf32, #tpu.memory_space<vmem>>, %arg6: memref<128x16xf32, #tpu.memory_space<vmem>>, %arg7: memref<2x128xf32, #tpu.memory_space<vmem>>, %arg8: memref<128x1xf32, #tpu.memory_space<vmem>>) attributes {dimension_semantics = [#tpu.dimension_semantics<parallel>, #tpu.dimension_semantics<arbitrary>], iteration_bounds = array<i64: 2, 1>, scalar_prefetch = 0 : i64, scratch_operands = 1 : i64, tpu.core_type = #tpu.core_type<tc>, window_params = [{transform_indices = @transform_0, window_bounds = array<i64: 128, 64>}, {transform_indices = @transform_1, window_bounds = array<i64: 128, 64>}, {transform_indices = @transform_2, window_bounds = array<i64: 128, 16>}, {transform_indices = @transform_3, window_bounds = array<i64: 128, 16>}, {transform_indices = @transform_4, window_bounds = array<i64: 128, 16>}, {transform_indices = @transform_5, window_bounds = array<i64: 2, 128>}]} {
    %c0_i32 = arith.constant 0 : i32
    %0 = arith.cmpi eq, %arg1, %c0_i32 : i32
    %1 = arith.extui %0 : i1 to i32
    %c0_i32_0 = arith.constant 0 : i32
    %2 = arith.cmpi ne, %1, %c0_i32_0 : i32
    scf.if %2 {
      %cst_13 = arith.constant 0.000000e+00 : f32
      %24 = vector.broadcast %cst_13 : f32 to vector<128x1xf32>
      %c0_14 = arith.constant 0 : index
      %c0_15 = arith.constant 0 : index
      %25 = vector.load %arg8[%c0_14, %c0_15] : memref<128x1xf32, #tpu.memory_space<vmem>>, vector<128x1xf32>
      tpu.vector_store %arg8[%c0_14, %c0_15], %24 {strides = array<i32>} : memref<128x1xf32, #tpu.memory_space<vmem>>, vector<128x1xf32>,
    } else {
    }
    %c0 = arith.constant 0 : index
    %c0_1 = arith.constant 0 : index
    %3 = vector.load %arg2[%c0, %c0_1] : memref<128x64xf32, #tpu.memory_space<vmem>>, vector<128x64xf32>
    %c0_2 = arith.constant 0 : index
    %c0_3 = arith.constant 0 : index
    %4 = vector.load %arg3[%c0_2, %c0_3] : memref<128x64xf32, #tpu.memory_space<vmem>>, vector<128x64xf32>
    %cst = arith.constant 1.000000e-07 : f32
    %5 = vector.broadcast %cst : f32 to vector<128x64xf32>
    %6 = arith.addf %3, %5 : vector<128x64xf32>
    %7 = math.log %6 : vector<128x64xf32>
    %cst_4 = arith.constant 1.000000e+00 : f32
    %8 = vector.broadcast %cst_4 : f32 to vector<128x64xf32>
    %9 = arith.subf %8, %3 : vector<128x64xf32>
    %cst_5 = arith.constant 1.000000e-07 : f32
    %10 = vector.broadcast %cst_5 : f32 to vector<128x64xf32>
    %11 = arith.addf %9, %10 : vector<128x64xf32>
    %12 = math.log %11 : vector<128x64xf32>
    %13 = arith.subf %7, %12 : vector<128x64xf32>
    %14 = arith.mulf %4, %13 : vector<128x64xf32>
    %15 = arith.addf %12, %14 : vector<128x64xf32>
    %c0_6 = arith.constant 0 : index
    %c0_7 = arith.constant 0 : index
    %16 = vector.load %arg8[%c0_6, %c0_7] : memref<128x1xf32, #tpu.memory_space<vmem>>, vector<128x1xf32>
    %cst_8 = arith.constant dense<0.000000e+00> : vector<128xf32>
    %17 = vector.multi_reduction <add>, %15, %cst_8 [1] : vector<128x64xf32> to vector<128xf32>
    %18 = vector.shape_cast %17 : vector<128xf32> to vector<128x1xf32>
    %19 = arith.addf %16, %18 : vector<128x1xf32>
    %c0_9 = arith.constant 0 : index
    %c0_10 = arith.constant 0 : index
    %20 = vector.load %arg8[%c0_9, %c0_10] : memref<128x1xf32, #tpu.memory_space<vmem>>, vector<128x1xf32>
    tpu.vector_store %arg8[%c0_9, %c0_10], %19 {strides = array<i32>} : memref<128x1xf32, #tpu.memory_space<vmem>>, vector<128x1xf32>,
    %c0_i32_11 = arith.constant 0 : i32
    %21 = arith.cmpi eq, %arg1, %c0_i32_11 : i32
    %22 = arith.extui %21 : i1 to i32
    %c0_i32_12 = arith.constant 0 : i32
    %23 = arith.cmpi ne, %22, %c0_i32_12 : i32
    scf.if %23 {
      %c0_13 = arith.constant 0 : index
      %c0_14 = arith.constant 0 : index
      %24 = vector.load %arg4[%c0_13, %c0_14] : memref<128x16xf32, #tpu.memory_space<vmem>>, vector<128x16xf32>
      %c0_15 = arith.constant 0 : index
      %c0_16 = arith.constant 0 : index
      %25 = vector.load %arg5[%c0_15, %c0_16] : memref<128x16xf32, #tpu.memory_space<vmem>>, vector<128x16xf32>
      %c0_17 = arith.constant 0 : index
      %c0_18 = arith.constant 0 : index
      %26 = vector.load %arg6[%c0_17, %c0_18] : memref<128x16xf32, #tpu.memory_space<vmem>>, vector<128x16xf32>
      %27 = arith.subf %24, %25 : vector<128x16xf32>
      %28 = arith.mulf %27, %27 : vector<128x16xf32>
      %cst_19 = arith.constant 0.000000e+00 : f32
      %29 = vector.broadcast %cst_19 : f32 to vector<128x16xf32>
      %30 = arith.subf %29, %26 : vector<128x16xf32>
      %31 = math.exp %30 : vector<128x16xf32>
      %32 = arith.mulf %28, %31 : vector<128x16xf32>
      %33 = arith.addf %26, %32 : vector<128x16xf32>
      %34 = arith.mulf %24, %24 : vector<128x16xf32>
      %35 = arith.subf %33, %34 : vector<128x16xf32>
      %cst_20 = arith.constant dense<0.000000e+00> : vector<128xf32>
      %36 = vector.multi_reduction <add>, %35, %cst_20 [1] : vector<128x16xf32> to vector<128xf32>
      %cst_21 = arith.constant 5.000000e-01 : f32
      %37 = vector.broadcast %cst_21 : f32 to vector<128xf32>
      %38 = arith.mulf %37, %36 : vector<128xf32>
      %c0_22 = arith.constant 0 : index
      %c0_23 = arith.constant 0 : index
      %39 = vector.load %arg8[%c0_22, %c0_23] : memref<128x1xf32, #tpu.memory_space<vmem>>, vector<128x1xf32>
      %40 = vector.shape_cast %39 : vector<128x1xf32> to vector<128xf32>
      %c0_24 = arith.constant 0 : index
      %c0_25 = arith.constant 0 : index
      %41 = vector.load %arg7[%c0_24, %c0_25] : memref<2x128xf32, #tpu.memory_space<vmem>>, vector<1x128xf32>
      %42 = vector.shape_cast %41 : vector<1x128xf32> to vector<128xf32>
      %43 = vector.shape_cast %40 : vector<128xf32> to vector<1x128xf32>
      tpu.vector_store %arg7[%c0_24, %c0_25], %43 {strides = array<i32>} : memref<2x128xf32, #tpu.memory_space<vmem>>, vector<1x128xf32>,
      %c1 = arith.constant 1 : index
      %c0_26 = arith.constant 0 : index
      %44 = vector.load %arg7[%c1, %c0_26] : memref<2x128xf32, #tpu.memory_space<vmem>>, vector<1x128xf32>
      %45 = vector.shape_cast %44 : vector<1x128xf32> to vector<128xf32>
      %46 = vector.shape_cast %38 : vector<128xf32> to vector<1x128xf32>
      tpu.vector_store %arg7[%c1, %c0_26], %46 {strides = array<i32>} : memref<2x128xf32, #tpu.memory_space<vmem>>, vector<1x128xf32>,
    } else {
    }
    return
  }
  func.func @transform_0(%arg0: i32, %arg1: i32) -> (i32, i32) {
    %c0_i32 = arith.constant 0 : i32
    return %arg0, %arg1 : i32, i32
  }
  func.func @transform_1(%arg0: i32, %arg1: i32) -> (i32, i32) {
    %c0_i32 = arith.constant 0 : i32
    return %arg0, %arg1 : i32, i32
  }
  func.func @transform_2(%arg0: i32, %arg1: i32) -> (i32, i32) {
    %c0_i32 = arith.constant 0 : i32
    %c0_i32_0 = arith.constant 0 : i32
    return %arg0, %c0_i32 : i32, i32
  }
  func.func @transform_3(%arg0: i32, %arg1: i32) -> (i32, i32) {
    %c0_i32 = arith.constant 0 : i32
    %c0_i32_0 = arith.constant 0 : i32
    return %arg0, %c0_i32 : i32, i32
  }
  func.func @transform_4(%arg0: i32, %arg1: i32) -> (i32, i32) {
    %c0_i32 = arith.constant 0 : i32
    %c0_i32_0 = arith.constant 0 : i32
    return %arg0, %c0_i32 : i32, i32
  }
  func.func @transform_5(%arg0: i32, %arg1: i32) -> (i32, i32) {
    %c0_i32 = arith.constant 0 : i32
    %c0_i32_0 = arith.constant 0 : i32
    return %c0_i32, %arg0 : i32, i32
  }
}

</mosaic_0001>

<bundles_post_ra>
// kernel: tpu_custom_call.1
= control target key start
LH: loop header
LB: loop body
LE: loop exit
PB: predicated region body
PF: predicated region fallthrough
CT: control target
= control target key end

     0   :  { %10 = vsyncpa [#allocation4], 0  ;;  %s2158_s0 = inlined_call_operand.vmem [shape: f32[256,64], index: 0, kind: input, shape index: {}]   ;;  %s2159_s1 = inlined_call_operand.vmem [shape: f32[256,64], index: 1, kind: input, shape index: {}]   ;;  %s2160_s2 = inlined_call_operand.vmem [shape: f32[256,16], index: 2, kind: input, shape index: {}]   ;;  %s2161_s3 = inlined_call_operand.vmem [shape: f32[256,16], index: 3, kind: input, shape index: {}]   ;;  %s2162_s4 = inlined_call_operand.vmem [shape: f32[256,16], index: 4, kind: input, shape index: {}]   ;;  %s2163_s5 = inlined_call_operand.hbm [shape: f32[2,256], index: 5, kind: output, shape index: {}]  }
   0x1   :  { %12 = vsyncpa [#allocation4 + $0x1], 0  ;;  %s1631_s18 = smov 0   ;;  %s1633_s19 = smov 0  }
   0x2   :  { %s1635_s20 = smov 0   ;;  %s1637_s21 = smov 0  }
   0x3   :  { %s1639_s22 = smov 0   ;;  %s1641_s23 = smov 0  }
   0x4 LB: > { %s1343_s24 = sadd.s32 4294967295, %s1596_s23   ;;  %s1344_s25 = sadd.s32 4294967294, %s1596_s23   ;;  %s1596_s23 = sphi %s1641_s23, %s18_s23   ;;  %s1592_s22 = sphi %s1639_s22, %s2171_s22   ;;  %s1588_s21 = sphi %s1637_s21, %s2170_s21   ;;  %s1584_s20 = sphi %s1635_s20, %s2169_s20   ;;  %s1580_s19 = sphi %s1633_s19, %s2168_s19   ;;  %s1576_s18 = sphi %s1631_s18, %s2167_s18  }
   0x5   : > { %s30_s26 = sadd.s32 1, %s1592_s22  ;;  %s171_s27 = sadd.s32 1, %s1584_s20 }
   0x6   : > { %p32_p0 = scmp.ge.s32.totalorder %s30_s26, 2  ;;  %p181_p1 = scmp.ne.s32.totalorder %s1584_s20, %s1580_s19 }
   0x7   : > { %p182_p2 = scmp.eq.s32.totalorder %s1343_s24, 1  ;;  %p187_p3 = scmp.ne.s32.totalorder %s1580_s19, %s1576_s18 }
   0x8   : > { %s2173_s26 = smov (%p32_p0, %s30_s26), 0  ;;  %p188_p5 = scmp.eq.s32.totalorder %s1344_s25, 1 }
   0x9   : > { %p1671_p4 = por %p182_p2, %p181_p1  ;;  %s168_s29 = ssub.s32 %s1592_s22, %s2173_s26 }
   0xa   : > { %p1347_p6 = scmp.ge.s32.totalorder %s1596_s23, 1  ;;  %p169_p7 = scmp.eq.s32.totalorder %s168_s29, 0 }
   0xb   : > { %p1678_p8 = por %p188_p5, %p187_p3  ;;  %p257_p9 = scmp.lt.s32.totalorder %s1596_s23, 3 }
   0xc   : > { %s1684_s6 = scalar_select %p169_p7, %s1584_s20, %s171_s27  }
   0xd   : > { %p258_p10 = pnand %p1347_p6, %p257_p9 }
   0xe   : > { %s1349_s7 = sshll.u32 (!%p258_p10), %s1588_s21, 4  ;;  %vm351_vm0 = vcmask (!%p258_p10), 7168   ;;  %v1598_v0 = vmov (!%p258_p10), 0.0   ;;  %vm576_vm1 = vcmask (!%p258_p10), 523264   ;;  %vm853_vm2 = vcmask (!%p258_p10), 130048   ;;  %s1360_s13 = sshll.u32 (!%p258_p10), %s1588_s21, 5 }
   0xf   : > { %261 = sbr.rel (%p258_p10) target bundleno = 393 (0x189), region = 40  ;;  %p1687_p11 = scmp.lt.s32.totalorder (!%p258_p10), %s1349_s7, 31  ;;  %354 = vst.msk [vmem:[#allocation2 + $0x10] sm:$0xff] (!%p258_p10), %vm351_vm0, %v1598_v0  ;;  %352 = vst.msk [vmem:[#allocation2] sm:$0xff] (!%p258_p10), %vm351_vm0, %v1598_v0  ;;  %vm1009_vm3 = vcmask (!%p258_p10), 130112   ;;  %vm1016_vm4 = vcmask (!%p258_p10), 195712  }
  0x10   : > { %353 = vst.msk [vmem:[#allocation2 + $0x8] sm:$0xff] (!%p258_p10), %vm351_vm0, %v1598_v0  ;;  %355 = vst.msk [vmem:[#allocation2 + $0x18] sm:$0xff] (!%p258_p10), %vm351_vm0, %v1598_v0  ;;  %vm1023_vm5 = vcmask (!%p258_p10), 261312   ;;  %vm1030_vm6 = vcmask (!%p258_p10), 326912   ;;  %vm1037_vm7 = vcmask (!%p258_p10), 392512   ;;  %vm1044_vm8 = vcmask (!%p258_p10), 458112   ;;  %s2107_s17 = scalar_lea.hbm (!%p258_p10), %s2163_s5, %s1360_s13 }
  0x11   : > { %356 = vst.msk [vmem:[#allocation2 + $0x20] sm:$0xff] (!%p258_p10), %vm351_vm0, %v1598_v0  ;;  %357 = vst.msk [vmem:[#allocation2 + $0x28] sm:$0xff] (!%p258_p10), %vm351_vm0, %v1598_v0  ;;  %vm1051_vm9 = vcmask (!%p258_p10), 523712   ;;  %vm1058_vm10 = vcmask (!%p258_p10), 589312   ;;  %vm1065_vm11 = vcmask (!%p258_p10), 654912   ;;  %vm1072_vm12 = vcmask (!%p258_p10), 720512  }
  0x12   : > { %358 = vst.msk [vmem:[#allocation2 + $0x30] sm:$0xff] (!%p258_p10), %vm351_vm0, %v1598_v0  ;;  %359 = vst.msk [vmem:[#allocation2 + $0x38] sm:$0xff] (!%p258_p10), %vm351_vm0, %v1598_v0  ;;  %vm1079_vm13 = vcmask (!%p258_p10), 786112   ;;  %vm1086_vm14 = vcmask (!%p258_p10), 851712   ;;  %vm1093_vm15 = vcmask (!%p258_p10), 917312   ;;  %s1600_s25 = smov (!%p258_p10), [#allocation3]  }
  0x13   : > { %360 = vst.msk [vmem:[#allocation2 + $0x40] sm:$0xff] (!%p258_p10), %vm351_vm0, %v1598_v0  ;;  %361 = vst.msk [vmem:[#allocation2 + $0x48] sm:$0xff] (!%p258_p10), %vm351_vm0, %v1598_v0  ;;  %s1522_s27 = sshll.u32 (!%p258_p10), %s1600_s25, 4  ;;  %s1523_s27 = int_to_ptr.vmem [resolvable:$false] %s1522_s27 }
  0x14   : > { %362 = vst.msk [vmem:[#allocation2 + $0x50] sm:$0xff] (!%p258_p10), %vm351_vm0, %v1598_v0  ;;  %363 = vst.msk [vmem:[#allocation2 + $0x58] sm:$0xff] (!%p258_p10), %vm351_vm0, %v1598_v0 }
  0x15   : > { %364 = vst.msk [vmem:[#allocation2 + $0x60] sm:$0xff] (!%p258_p10), %vm351_vm0, %v1598_v0  ;;  %365 = vst.msk [vmem:[#allocation2 + $0x68] sm:$0xff] (!%p258_p10), %vm351_vm0, %v1598_v0 }
  0x16   : > { %366 = vst.msk [vmem:[#allocation2 + $0x70] sm:$0xff] %vm351_vm0, %v1598_v0  ;;  %367 = vst.msk [vmem:[#allocation2 + $0x78] sm:$0xff] %vm351_vm0, %v1598_v0  ;;  %s2175_s7 = smov (!%p1687_p11, %s1349_s7), 31 }
  0x17   : > { %s1709_s9 = sshll.u32 %s2175_s7, 3 }
  0x18   : > { %s1715_s12 = scalar_lea.vmem %s2158_s0, %s1709_s9  ;;  %s1731_s15 = scalar_lea.vmem %s2159_s1, %s1709_s9 }
  0x19   : > { %v370_v1 = vld [vmem:[%s1715_s12 + $0x10] sm:$0xff]  ;;  %v368_v2 = vld [vmem:[%s1715_s12] sm:$0xff]  ;;  %v371_v7 = vld [vmem:[%s1715_s12 + $0x18] sm:$0xff]  ;;  %s1748_s24 = scalar_lea.vmem %s2162_s4, %s1709_s9  ;;  %s1776_s29 = scalar_lea.vmem %s2160_s2, %s1709_s9 }
  0x1a   : > { %v402_v3 = vadd.f32 1e-07, %v370_v1  ;;  %v450_v4 = vsub.f32 1.0, %v370_v1  ;;  %v400_v5 = vadd.f32 1e-07, %v368_v2  ;;  %v448_v6 = vsub.f32 1.0, %v368_v2  ;;  %s1782_s10 = scalar_lea.vmem %s2161_s3, %s1709_s9 }
  0x1b   : > { %v369_v8 = vld [vmem:[%s1715_s12 + $0x8] sm:$0xff]  ;;  %v403_v10 = vadd.f32 1e-07, %v371_v7  ;;  %v451_v11 = vsub.f32 1.0, %v371_v7  ;;  %v372_v19 = vld [vmem:[%s1715_s12 + $0x20] sm:$0xff]  ;;  %v375_v20 = vld [vmem:[%s1715_s12 + $0x38] sm:$0xff] }
  0x1c   : > { %1422 = vlog2.f32 %v402_v3  ;;  %v466_v9 = vadd.f32 1e-07, %v450_v4  ;;  %v464_v12 = vadd.f32 1e-07, %v448_v6  ;;  %v449_v13 = vsub.f32 1.0, %v369_v8  ;;  %v373_v14 = vld [vmem:[%s1715_s12 + $0x28] sm:$0xff] }
  0x1d   : > { %1424 = vlog2.f32 %v400_v5  ;;  %v467_v15 = vadd.f32 1e-07, %v451_v11  ;;  %v401_v16 = vadd.f32 1e-07, %v369_v8  ;;  %v453_v17 = vsub.f32 1.0, %v373_v14  ;;  %v374_v25 = vld [vmem:[%s1715_s12 + $0x30] sm:$0xff] }
  0x1e   : > { %1426 = vlog2.f32 %v466_v9  ;;  %v465_v18 = vadd.f32 1e-07, %v449_v13  ;;  %v405_v21 = vadd.f32 1e-07, %v373_v14  ;;  %v452_v22 = vsub.f32 1.0, %v372_v19  ;;  %v377_v26 = vld [vmem:[%s1715_s12 + $0x48] sm:$0xff] }
  0x1f   : > { %1428 = vlog2.f32 %v464_v12  ;;  %v469_v23 = vadd.f32 1e-07, %v453_v17  ;;  %v455_v24 = vsub.f32 1.0, %v375_v20  ;;  %v404_v27 = vadd.f32 1e-07, %v372_v19  ;;  %v376_v30 = vld [vmem:[%s1715_s12 + $0x40] sm:$0xff] }
  0x20   : > { %1430 = vlog2.f32 %v403_v10  ;;  %v468_v28 = vadd.f32 1e-07, %v452_v22  ;;  %v454_v29 = vsub.f32 1.0, %v374_v25  ;;  %v407_v31 = vadd.f32 1e-07, %v375_v20  ;;  %v379_v35 = vld [vmem:[%s1715_s12 + $0x58] sm:$0xff] }
  0x21   : > { %1432 = vlog2.f32 %v467_v15  ;;  %v457_v32 = vsub.f32 1.0, %v377_v26  ;;  %v471_v33 = vadd.f32 1e-07, %v455_v24  ;;  %v456_v34 = vsub.f32 1.0, %v376_v30  ;;  %v378_v39 = vld [vmem:[%s1715_s12 + $0x50] sm:$0xff]  ;;  %v381_v53 = vld [vmem:[%s1715_s12 + $0x68] sm:$0xff] }
  0x22   : > { %1434 = vlog2.f32 %v401_v16  ;;  %v406_v37 = vadd.f32 1e-07, %v374_v25  ;;  %v409_v38 = vadd.f32 1e-07, %v377_v26  ;;  %v470_v42 = vadd.f32 1e-07, %v454_v29 }
  0x23   : > { %1436 = vlog2.f32 %v465_v18  ;;  %v459_v43 = vsub.f32 1.0, %v379_v35  ;;  %v386_v45 = vld [vmem:[%s1731_s15 + $0x10] sm:$0xff]  ;;  %v473_v47 = vadd.f32 1e-07, %v457_v32  ;;  %v408_v48 = vadd.f32 1e-07, %v376_v30 }
  0x24   : > { %1438 = vlog2.f32 %v405_v21  ;;  %v472_v51 = vadd.f32 1e-07, %v456_v34  ;;  %v458_v52 = vsub.f32 1.0, %v378_v39  ;;  %v411_v56 = vadd.f32 1e-07, %v379_v35  ;;  %v384_v60 = vld [vmem:[%s1731_s15] sm:$0xff] }
  0x25   : > { %1440 = vlog2.f32 %v469_v23  ;;  %v1737_v57 = vadd.f32 1e-07, %v378_v39  ;;  %v475_v62 = vadd.f32 1e-07, %v459_v43  ;;  %v461_v2 = vsub.f32 1.0, %v381_v53  ;;  %v387_v5 = vld [vmem:[%s1731_s15 + $0x18] sm:$0xff] }
  0x26   : > { %v1423_v36 = vpop.eup %1422  ;;  %1442 = vlog2.f32 %v404_v27  ;;  %v474_v7 = vadd.f32 1e-07, %v458_v52  ;;  %v385_v14 = vld [vmem:[%s1731_s15 + $0x8] sm:$0xff]  ;;  %v413_v16 = vadd.f32 1e-07, %v381_v53  ;;  %v380_v32 = vld [vmem:[%s1715_s12 + $0x60] sm:$0xff] }
  0x27   : > { %v1425_v40 = vpop.eup %1424  ;;  %v421_v41 = vmul.f32 0.6931472, %v1423_v36  ;;  %1444 = vlog2.f32 %v468_v28  ;;  %v389_v24 = vld [vmem:[%s1731_s15 + $0x28] sm:$0xff]  ;;  %v477_v26 = vadd.f32 1e-07, %v461_v2  ;;  %s308_s9 = sand.u32 1, %s1580_s19  }
  0x28   : > { %v1427_v44 = vpop.eup %1426  ;;  %v417_v46 = vmul.f32 0.6931472, %v1425_v40  ;;  %1446 = vlog2.f32 %v407_v31  ;;  %v412_v36 = vadd.f32 1e-07, %v380_v32  ;;  %v1755_v43 = vld [vmem:[%s1748_s24 + $0x8] sm:$0xff]  ;;  %s1348_s11 = sshll.u32 %s308_s9, 1 }
  0x29   : > { %v1429_v49 = vpop.eup %1428  ;;  %v485_v50 = vmul.f32 0.6931472, %v1427_v44  ;;  %1448 = vlog2.f32 %v471_v33  ;;  %s1209_s21 = scalar_lea.sflag [#allocation4], %s308_s9 }
  0x2a   : > { %v1431_v54 = vpop.eup %1430  ;;  %v481_v55 = vmul.f32 0.6931472, %v1429_v49  ;;  %1450 = vlog2.f32 %v406_v37 }
  0x2b   : > { %v1433_v58 = vpop.eup %1432  ;;  %v514_v59 = vsub.f32 %v421_v41, %v485_v50  ;;  %v423_v61 = vmul.f32 0.6931472, %v1431_v54  ;;  %1452 = vlog2.f32 %v470_v42  ;;  %v388_v41 = vld [vmem:[%s1731_s15 + $0x20] sm:$0xff] }
  0x2c   : > { %v1435_v63 = vpop.eup %1434  ;;  %v512_v0 = vsub.f32 %v417_v46, %v481_v55  ;;  %v487_v1 = vmul.f32 0.6931472, %v1433_v58  ;;  %1454 = vlog2.f32 %v409_v38  ;;  %v391_v46 = vld [vmem:[%s1731_s15 + $0x38] sm:$0xff] }
  0x2d   : > { %v1437_v3 = vpop.eup %1436  ;;  %v530_v4 = vmul.f32 %v514_v59, %v386_v45  ;;  %v419_v6 = vmul.f32 0.6931472, %v1435_v63  ;;  %1456 = vlog2.f32 %v473_v47  ;;  %v742_v59 = vsub.f32 0.0, %v1755_v43 }
  0x2e   : > { %v1439_v8 = vpop.eup %1438  ;;  %v528_v9 = vmul.f32 %v512_v0, %v384_v60  ;;  %v515_v10 = vsub.f32 %v423_v61, %v487_v1  ;;  %v483_v11 = vmul.f32 0.6931472, %v1437_v3  ;;  %1458 = vlog2.f32 %v408_v48  ;;  %v382_v0 = vld [vmem:[%s1715_s12 + $0x70] sm:$0xff]  ;;  %v393_v3 = vld [vmem:[%s1731_s15 + $0x48] sm:$0xff] }
  0x2f   : > { %v1441_v12 = vpop.eup %1440  ;;  %v546_v13 = vadd.f32 %v530_v4, %v485_v50  ;;  %v427_v15 = vmul.f32 0.6931472, %v1439_v8  ;;  %1460 = vlog2.f32 %v472_v51  ;;  %v460_v48 = vsub.f32 1.0, %v380_v32 }
  0x30   : > { %v1443_v17 = vpop.eup %1442  ;;  %v544_v18 = vadd.f32 %v528_v9, %v481_v55  ;;  %v531_v19 = vmul.f32 %v515_v10, %v387_v5  ;;  %v513_v20 = vsub.f32 %v419_v6, %v483_v11  ;;  %v491_v21 = vmul.f32 0.6931472, %v1441_v12  ;;  %v383_v10 = vld [vmem:[%s1715_s12 + $0x78] sm:$0xff]  ;;  %s2069_s12 = scalar_lea.vmem [#allocation3], %s1348_s11 }
  0x31   : > { %v1445_v22 = vpop.eup %1444  ;;  %v583_v23 = vsel %vm576_vm1, %v546_v13, 0.0  ;;  %v425_v25 = vmul.f32 0.6931472, %v1443_v17  ;;  %1462 = vlog2.f32 %v411_v56  ;;  %v390_v56 = vld [vmem:[%s1731_s15 + $0x30] sm:$0xff]  ;;  %v476_v5 = vadd.f32 1e-07, %v460_v48 }
  0x32   : > { %v1447_v27 = vpop.eup %1446  ;;  %584 = vadd.xlane.f32.xlu1 %v583_v23  ;;  %v577_v28 = vsel %vm576_vm1, %v544_v18, 0.0  ;;  %v547_v29 = vadd.f32 %v531_v19, %v487_v1  ;;  %v529_v30 = vmul.f32 %v513_v20, %v385_v14  ;;  %v517_v31 = vsub.f32 %v427_v15, %v491_v21  ;;  %v392_v13 = vld [vmem:[%s1731_s15 + $0x40] sm:$0xff]  ;;  %s1222_s14 = sshll.u32 %s2069_s12, 4  ;;  %s2109_s14 = int_to_ptr.vmem [resolvable:$true] %s1222_s14 }
  0x33   : > { %v1449_v33 = vpop.eup %1448  ;;  %578 = vadd.xlane.f32.xlu0 %v577_v28  ;;  %v489_v34 = vmul.f32 0.6931472, %v1445_v22  ;;  %v431_v35 = vmul.f32 0.6931472, %v1447_v27  ;;  %1464 = vlog2.f32 %v475_v62  ;;  %v759_v14 = vmul.f32 1.442695, %v742_v59  ;;  %p1525_p1 = scmp.lt.s32.totalorder %s2109_s14, %s1523_s27 }
  0x34   : > { %v1451_v37 = vpop.eup %1450  ;;  %v586_v38 = vsel %vm576_vm1, %v547_v29, 0.0  ;;  %v545_v39 = vadd.f32 %v529_v30, %v483_v11  ;;  %v533_v40 = vmul.f32 %v517_v31, %v389_v24  ;;  %v495_v42 = vmul.f32 0.6931472, %v1449_v33  ;;  %v1770_v20 = vld [vmem:[%s1748_s24] sm:$0xff]  ;;  %v395_v30 = vld [vmem:[%s1731_s15 + $0x58] sm:$0xff]  ;;  %v679_v59 = vld [vmem:[%s1782_s10 + $0x10] sm:$0xff] }
  0x35   : > { %v1453_v44 = vpop.eup %1452  ;;  %v516_v45 = vsub.f32 %v425_v25, %v489_v34  ;;  %v429_v47 = vmul.f32 0.6931472, %v1451_v37  ;;  %1466 = vlog2.f32 %v1737_v57  ;;  %v462_v15 = vsub.f32 1.0, %v382_v0  ;;  %v661_v48 = vld [vmem:[%s1776_s29] sm:$0xff] }
  0x36   : > { %v1455_v49 = vpop.eup %1454  ;;  %587 = vadd.xlane.f32.xlu1 %v586_v38  ;;  %v580_v50 = vsel %vm576_vm1, %v545_v39, 0.0  ;;  %v549_v51 = vadd.f32 %v533_v40, %v491_v21  ;;  %v519_v52 = vsub.f32 %v431_v35, %v495_v42  ;;  %v493_v53 = vmul.f32 0.6931472, %v1453_v44  ;;  %v662_v38 = vld [vmem:[%s1776_s29 + $0x8] sm:$0xff]  ;;  %v1791_v40 = vld [vmem:[%s1748_s24 + $0x10] sm:$0xff] }
  0x37   : > { %v1457_v54 = vpop.eup %1456  ;;  %581 = vadd.xlane.f32.xlu0 %v580_v50  ;;  %v532_v55 = vmul.f32 %v516_v45, %v388_v41  ;;  %v435_v58 = vmul.f32 0.6931472, %v1455_v49  ;;  %1468 = vlog2.f32 %v474_v7  ;;  %v414_v23 = vadd.f32 1e-07, %v382_v0  ;;  %v678_v39 = vld [vmem:[%s1782_s10 + $0x8] sm:$0xff]  ;;  %v677_v49 = vld [vmem:[%s1782_s10] sm:$0xff] }
  0x38   : > { %v1459_v60 = vpop.eup %1458  ;;  %v592_v57 = vsel %vm576_vm1, %v549_v51, 0.0  ;;  %v535_v61 = vmul.f32 %v519_v52, %v391_v46  ;;  %v518_v62 = vsub.f32 %v429_v47, %v493_v53  ;;  %v499_v63 = vmul.f32 0.6931472, %v1457_v54  ;;  %v394_v51 = vld [vmem:[%s1731_s15 + $0x50] sm:$0xff] }
  0x39   : > { %v1461_v1 = vpop.eup %1460  ;;  %v548_v2 = vadd.f32 %v532_v55, %v489_v34  ;;  %v433_v4 = vmul.f32 0.6931472, %v1459_v60  ;;  %1470 = vlog2.f32 %v413_v16  ;;  %v463_v24 = vsub.f32 1.0, %v383_v10  ;;  %v1801_v60 = vld [vmem:[%s1748_s24 + $0x18] sm:$0xff] }
  0x3a   : > { %593 = vadd.xlane.f32.xlu1 %v592_v57  ;;  %v551_v6 = vadd.f32 %v535_v61, %v495_v42  ;;  %v534_v7 = vmul.f32 %v518_v62, %v390_v56  ;;  %v521_v8 = vsub.f32 %v435_v58, %v499_v63  ;;  %v497_v9 = vmul.f32 0.6931472, %v1461_v1  ;;  %v663_v58 = vld [vmem:[%s1776_s29 + $0x10] sm:$0xff] }
  0x3b   : > { %v1463_v11 = vpop.eup %1462  ;;  %v589_v12 = vsel %vm576_vm1, %v548_v2, 0.0  ;;  %1472 = vlog2.f32 %v477_v26  ;;  %v478_v31 = vadd.f32 1e-07, %v462_v15  ;;  %v415_v32 = vadd.f32 1e-07, %v383_v10  ;;  %v1805_v2 = vld [vmem:[%s1748_s24 + $0x20] sm:$0xff] }
  0x3c   : > { %590 = vadd.xlane.f32.xlu0 %v589_v12  ;;  %v598_v16 = vsel %vm576_vm1, %v551_v6, 0.0  ;;  %v550_v17 = vadd.f32 %v534_v7, %v493_v53  ;;  %v537_v18 = vmul.f32 %v521_v8, %v393_v3  ;;  %v520_v19 = vsub.f32 %v433_v4, %v497_v9  ;;  %v397_v4 = vld [vmem:[%s1731_s15 + $0x68] sm:$0xff] }
  0x3d   : > { %v1465_v21 = vpop.eup %1464  ;;  %v439_v22 = vmul.f32 0.6931472, %v1463_v11  ;;  %1474 = vlog2.f32 %v412_v36  ;;  %v741_v33 = vsub.f32 0.0, %v1770_v20  ;;  %v479_v42 = vadd.f32 1e-07, %v463_v24  ;;  %v1810_v12 = vld [vmem:[%s1748_s24 + $0x28] sm:$0xff] }
  0x3e   : > { %599 = vadd.xlane.f32.xlu1 %v598_v16  ;;  %v595_v25 = vsel %vm576_vm1, %v550_v17, 0.0  ;;  %v553_v26 = vadd.f32 %v537_v18, %v499_v63  ;;  %v536_v27 = vmul.f32 %v520_v19, %v392_v13  ;;  %v503_v28 = vmul.f32 0.6931472, %v1465_v21  ;;  %v664_v16 = vld [vmem:[%s1776_s29 + $0x18] sm:$0xff] }
  0x3f   : > { %v1467_v29 = vpop.eup %1466  ;;  %1476 = vlog2.f32 %v476_v5  ;;  %v757_v44 = vmul.f32 1.442695, %v741_v33  ;;  %v710_v52 = vsub.f32 %v662_v38, %v678_v39  ;;  %v743_v53 = vsub.f32 0.0, %v1791_v40  ;;  %v680_v17 = vld [vmem:[%s1782_s10 + $0x18] sm:$0xff]  ;;  %v1831_v39 = vld [vmem:[%s1748_s24 + $0x30] sm:$0xff] }
  0x40   : > { %596 = vadd.xlane.f32.xlu0 %v595_v25  ;;  %v604_v34 = vsel %vm576_vm1, %v553_v26, 0.0  ;;  %v552_v35 = vadd.f32 %v536_v27, %v497_v9  ;;  %v523_v36 = vsub.f32 %v439_v22, %v503_v28  ;;  %v437_v37 = vmul.f32 0.6931472, %v1467_v29  ;;  %v1821_v25 = vld [vmem:[%s1776_s29 + $0x20] sm:$0xff] }
  0x41   : > { %v1469_v41 = vpop.eup %1468  ;;  %1478 = vpow2.f32 %v759_v14  ;;  %v709_v61 = vsub.f32 %v661_v48, %v677_v49  ;;  %v761_v62 = vmul.f32 1.442695, %v743_v53  ;;  %v726_v5 = vmul.f32 %v710_v52, %v710_v52  ;;  %v681_v26 = vld [vmem:[%s1782_s10 + $0x20] sm:$0xff]  ;;  %v398_v52 = vld [vmem:[%s1731_s15 + $0x70] sm:$0xff] }
  0x42   : > { %605 = vadd.xlane.f32.xlu1 %v604_v34  ;;  %v601_v45 = vsel %vm576_vm1, %v552_v35, 0.0  ;;  %v539_v46 = vmul.f32 %v523_v36, %v395_v30  ;;  %v501_v47 = vmul.f32 0.6931472, %v1469_v41  ;;  %1480 = vlog2.f32 %v414_v23 }
  0x43   : > { %v1471_v50 = vpop.eup %1470  ;;  %1482 = vlog2.f32 %v478_v31  ;;  %v711_v6 = vsub.f32 %v663_v58, %v679_v59  ;;  %v744_v7 = vsub.f32 0.0, %v1801_v60  ;;  %v822_v11 = vmul.f32 %v662_v38, %v662_v38  ;;  %v682_v38 = vld [vmem:[%s1782_s10 + $0x28] sm:$0xff] }
  0x44   : > { %602 = vadd.xlane.f32.xlu0 %v601_v45  ;;  %v555_v54 = vadd.f32 %v539_v46, %v503_v28  ;;  %v522_v55 = vsub.f32 %v437_v37, %v501_v47  ;;  %v443_v56 = vmul.f32 0.6931472, %v1471_v50  ;;  %1484 = vlog2.f32 %v415_v32  ;;  %v396_v28 = vld [vmem:[%s1731_s15 + $0x60] sm:$0xff]  ;;  %v1827_v37 = vld [vmem:[%s1776_s29 + $0x28] sm:$0xff] }
  0x45   : > { %v1473_v57 = vpop.eup %1472  ;;  %1486 = vlog2.f32 %v479_v42  ;;  %v725_v14 = vmul.f32 %v709_v61, %v709_v61  ;;  %v1812_v15 = vmul.f32 %v661_v48, %v661_v48  ;;  %v763_v18 = vmul.f32 1.442695, %v744_v7 }
  0x46   : > { %v610_v63 = vsel %vm576_vm1, %v555_v54, 0.0  ;;  %v538_v0 = vmul.f32 %v522_v55, %v394_v51  ;;  %v507_v1 = vmul.f32 0.6931472, %v1473_v57  ;;  %1488 = vpow2.f32 %v757_v44 }
  0x47   : > { %v1475_v3 = vpop.eup %1474  ;;  %611 = vadd.xlane.f32.xlu1 %v610_v63  ;;  %1490 = vpow2.f32 %v761_v62  ;;  %v745_v19 = vsub.f32 0.0, %v1805_v2  ;;  %v1818_v24 = vmul.f32 %v663_v58, %v663_v58  ;;  %v727_v29 = vmul.f32 %v711_v6, %v711_v6  ;;  %v399_v62 = vld [vmem:[%s1731_s15 + $0x78] sm:$0xff] }
  0x48   : > { %v554_v8 = vadd.f32 %v538_v0, %v501_v47  ;;  %v525_v9 = vsub.f32 %v443_v56, %v507_v1  ;;  %v441_v10 = vmul.f32 0.6931472, %v1475_v3  ;;  %1492 = vpow2.f32 %v763_v18 }
  0x49   : > { %v1477_v13 = vpop.eup %1476  ;;  %v765_v30 = vmul.f32 1.442695, %v745_v19  ;;  %v746_v31 = vsub.f32 0.0, %v1810_v12  ;;  %v712_v36 = vsub.f32 %v664_v16, %v680_v17  ;;  %v713_v44 = vsub.f32 %v1821_v25, %v681_v26 }
  0x4a   : > { %v607_v21 = vsel %vm576_vm1, %v554_v8, 0.0  ;;  %v541_v22 = vmul.f32 %v525_v9, %v397_v4  ;;  %v505_v23 = vmul.f32 0.6931472, %v1477_v13  ;;  %v714_v54 = vsub.f32 %v1827_v37, %v682_v38  ;;  %v1841_v4 = vld [vmem:[%s1748_s24 + $0x38] sm:$0xff]  ;;  %v1846_v9 = vld [vmem:[%s1776_s29 + $0x30] sm:$0xff]  ;;  %v1868_v38 = vld [vmem:[%s1748_s24 + $0x48] sm:$0xff] }
  0x4b   : > { %v1479_v27 = vpop.eup %1478  ;;  %608 = vadd.xlane.f32.xlu0 %v607_v21  ;;  %1494 = vpow2.f32 %v765_v30  ;;  %v767_v45 = vmul.f32 1.442695, %v746_v31  ;;  %v747_v55 = vsub.f32 0.0, %v1831_v39  ;;  %v728_v0 = vmul.f32 %v712_v36, %v712_v36 }
  0x4c   : > { %v1481_v32 = vpop.eup %1480  ;;  %v557_v33 = vadd.f32 %v541_v22, %v507_v1  ;;  %v524_v34 = vsub.f32 %v441_v10, %v505_v23  ;;  %v790_v35 = vmul.f32 %v1479_v27, %v726_v5  ;;  %v824_v1 = vmul.f32 %v664_v16, %v664_v16  ;;  %v683_v10 = vld [vmem:[%s1782_s10 + $0x30] sm:$0xff] }
  0x4d   : > { %v1483_v41 = vpop.eup %1482  ;;  %v445_v42 = vmul.f32 0.6931472, %v1481_v32  ;;  %1496 = vpow2.f32 %v767_v45  ;;  %v769_v3 = vmul.f32 1.442695, %v747_v55  ;;  %v729_v16 = vmul.f32 %v713_v44, %v713_v44  ;;  %v1873_v45 = vld [vmem:[%s1776_s29 + $0x40] sm:$0xff] }
  0x4e   : > { %v1485_v46 = vpop.eup %1484  ;;  %v616_v47 = vsel %vm576_vm1, %v557_v33, 0.0  ;;  %v540_v48 = vmul.f32 %v524_v34, %v396_v28  ;;  %v806_v49 = vadd.f32 %v790_v35, %v1755_v43  ;;  %v509_v50 = vmul.f32 0.6931472, %v1483_v41  ;;  %v1864_v34 = vld [vmem:[%s1776_s29 + $0x38] sm:$0xff] }
  0x4f   : > { %v1487_v51 = vpop.eup %1486  ;;  %617 = vadd.xlane.f32.xlu1 %v616_v47  ;;  %v447_v53 = vmul.f32 0.6931472, %v1485_v46  ;;  %1498 = vpow2.f32 %v769_v3  ;;  %v730_v19 = vmul.f32 %v714_v54, %v714_v54  ;;  %v748_v21 = vsub.f32 0.0, %v1841_v4  ;;  %v684_v35 = vld [vmem:[%s1782_s10 + $0x38] sm:$0xff]  ;;  %v685_v46 = vld [vmem:[%s1782_s10 + $0x40] sm:$0xff]  ;;  %v1877_v47 = vld [vmem:[%s1748_s24 + $0x50] sm:$0xff] }
  0x50   : > { %v1489_v56 = vpop.eup %1488  ;;  %v556_v58 = vadd.f32 %v540_v48, %v505_v23  ;;  %v838_v59 = vsub.f32 %v806_v49, %v822_v11  ;;  %v526_v57 = vsub.f32 %v445_v42, %v509_v50  ;;  %v511_v61 = vmul.f32 0.6931472, %v1487_v51  ;;  %v1850_v11 = vld [vmem:[%s1748_s24 + $0x40] sm:$0xff]  ;;  %v686_v3 = vld [vmem:[%s1782_s10 + $0x48] sm:$0xff] }
  0x51   : > { %v1491_v43 = vpop.eup %1490  ;;  %v789_v63 = vmul.f32 %v1489_v56, %v725_v14  ;;  %v715_v27 = vsub.f32 %v1846_v9, %v683_v10  ;;  %v771_v31 = vmul.f32 1.442695, %v748_v21  ;;  %v750_v51 = vsub.f32 0.0, %v1868_v38 }
  0x52   : > { %v613_v5 = vsel %vm576_vm1, %v556_v58, 0.0  ;;  %v857_v6 = vsel %vm853_vm2, %v838_v59, 0.0  ;;  %v542_v7 = vmul.f32 %v526_v57, %v398_v52  ;;  %v527_v8 = vsub.f32 %v447_v53, %v511_v61  ;;  %v1493_v22 = vpop.eup %1492  ;;  %v1890_v59 = vld [vmem:[%s1748_s24 + $0x58] sm:$0xff] }
  0x53   : > { %614 = vadd.xlane.f32.xlu0 %v613_v5  ;;  %858 = vadd.xlane.f32.xlu1 %v857_v6  ;;  %v805_v13 = vadd.f32 %v789_v63, %v1770_v20  ;;  %v791_v14 = vmul.f32 %v1491_v43, %v727_v29  ;;  %v749_v20 = vsub.f32 0.0, %v1850_v11  ;;  %v792_v30 = vmul.f32 %v1493_v22, %v728_v0  ;;  %v1893_v43 = vld [vmem:[%s1748_s24 + $0x60] sm:$0xff]  ;;  %v1900_v5 = vld [vmem:[%s1748_s24 + $0x68] sm:$0xff] }
  0x54   : > { %v558_v17 = vadd.f32 %v542_v7, %v509_v50  ;;  %v543_v18 = vmul.f32 %v527_v8, %v399_v62  ;;  %1500 = vpow2.f32 %v771_v31  ;;  %v731_v48 = vmul.f32 %v715_v27, %v715_v27  ;;  %v671_v7 = vld [vmem:[%s1776_s29 + $0x50] sm:$0xff] }
  0x55   : > { %v837_v23 = vsub.f32 %v805_v13, %v1812_v15  ;;  %v807_v26 = vadd.f32 %v791_v14, %v1791_v40  ;;  %v1495_v32 = vpop.eup %1494  ;;  %v825_v40 = vmul.f32 %v1821_v25, %v1821_v25  ;;  %v773_v36 = vmul.f32 1.442695, %v749_v20  ;;  %v687_v8 = vld [vmem:[%s1782_s10 + $0x50] sm:$0xff] }
  0x56   : > { %v619_v28 = vsel %vm576_vm1, %v558_v17, 0.0  ;;  %v559_v29 = vadd.f32 %v543_v18, %v511_v61  ;;  %v808_v42 = vadd.f32 %v792_v30, %v1801_v60  ;;  %v793_v44 = vmul.f32 %v1495_v32, %v729_v16  ;;  %v1911_v27 = vld [vmem:[%s1748_s24 + $0x70] sm:$0xff]  ;;  %v688_v30 = vld [vmem:[%s1782_s10 + $0x58] sm:$0xff] }
  0x57   : > { %620 = vadd.xlane.f32.xlu0 %v619_v28  ;;  %v854_v33 = vsel %vm853_vm2, %v837_v23, 0.0  ;;  %v839_v15 = vsub.f32 %v807_v26, %v1818_v24  ;;  %v1497_v24 = vpop.eup %1496  ;;  %v826_v25 = vmul.f32 %v1827_v37, %v1827_v37  ;;  %1502 = vpow2.f32 %v773_v36  ;;  %v1918_v32 = vld [vmem:[%s1748_s24 + $0x78] sm:$0xff]  ;;  %v689_v36 = vld [vmem:[%s1782_s10 + $0x60] sm:$0xff]  ;;  %s1518_s24 = scalar_lea.vmem %s2109_s14, 32 }
  0x58   : > { %v622_v41 = vsel %vm576_vm1, %v559_v29, 0.0  ;;  %v840_v49 = vsub.f32 %v808_v42, %v824_v1  ;;  %v809_v50 = vadd.f32 %v793_v44, %v1805_v2  ;;  %v794_v60 = vmul.f32 %v1497_v24, %v730_v19  ;;  %v670_v1 = vld [vmem:[%s1776_s29 + $0x48] sm:$0xff]  ;;  %v672_v29 = vld [vmem:[%s1776_s29 + $0x58] sm:$0xff]  ;;  %p1519_p12 = scmp.ne.s32.totalorder %s2109_s14, %s1518_s24 }
  0x59   : > { %623 = vadd.xlane.f32.xlu1 %v622_v41  ;;  %v860_v52 = vsel %vm853_vm2, %v839_v15, 0.0  ;;  %v716_v53 = vsub.f32 %v1864_v34, %v684_v35  ;;  %v717_v54 = vsub.f32 %v1873_v45, %v685_v46  ;;  %v751_v37 = vsub.f32 0.0, %v1877_v47  ;;  %v1499_v57 = vpop.eup %1498  ;;  %v673_v35 = vld [vmem:[%s1776_s29 + $0x60] sm:$0xff]  ;;  %v674_v44 = vld [vmem:[%s1776_s29 + $0x68] sm:$0xff] }
  0x5a   : > { %v863_v55 = vsel %vm853_vm2, %v840_v49, 0.0  ;;  %v841_v56 = vsub.f32 %v809_v50, %v825_v40  ;;  %v810_v2 = vadd.f32 %v794_v60, %v1810_v12  ;;  %v775_v58 = vmul.f32 1.442695, %v750_v51  ;;  %p1520_p13 = pnand %p1519_p12, %p1671_p4 }
  0x5b   : > { %855 = vadd.xlane.f32.xlu0 %v854_v33  ;;  %v777_v61 = vmul.f32 1.442695, %v751_v37  ;;  %v795_v63 = vmul.f32 %v1499_v57, %v731_v48  ;;  %v827_v0 = vmul.f32 %v1846_v9, %v1846_v9  ;;  %v732_v12 = vmul.f32 %v716_v53, %v716_v53  ;;  %v691_v57 = vld [vmem:[%s1782_s10 + $0x70] sm:$0xff] }
  0x5c   : > { %v842_v62 = vsub.f32 %v810_v2, %v826_v25  ;;  %1504 = vpow2.f32 %v775_v58  ;;  %v733_v6 = vmul.f32 %v717_v54, %v717_v54  ;;  %v752_v10 = vsub.f32 0.0, %v1890_v59  ;;  %v675_v58 = vld [vmem:[%s1776_s29 + $0x70] sm:$0xff]  ;;  %p1521_p0 = pneg %p1520_p13 }
  0x5d   : > { %864 = vadd.xlane.f32.xlu1 %v863_v55  ;;  %1506 = vpow2.f32 %v777_v61  ;;  %v866_v13 = vsel %vm853_vm2, %v841_v56, 0.0  ;;  %v811_v9 = vadd.f32 %v795_v63, %v1831_v39  ;;  %v753_v16 = vsub.f32 0.0, %v1893_v43 }
  0x5e   : > { %v869_v14 = vsel %vm853_vm2, %v842_v62, 0.0  ;;  %v718_v17 = vsub.f32 %v670_v1, %v686_v3  ;;  %v779_v18 = vmul.f32 1.442695, %v752_v10  ;;  %v754_v19 = vsub.f32 0.0, %v1900_v5  ;;  %v1501_v21 = vpop.eup %1500 }
  0x5f   : > { %861 = vadd.xlane.f32.xlu0 %v860_v52  ;;  %v843_v22 = vsub.f32 %v811_v9, %v827_v0  ;;  %v719_v23 = vsub.f32 %v671_v7, %v687_v8  ;;  %v781_v26 = vmul.f32 1.442695, %v753_v16  ;;  %v796_v39 = vmul.f32 %v1501_v21, %v732_v12  ;;  %v676_v0 = vld [vmem:[%s1776_s29 + $0x78] sm:$0xff]  ;;  %s1524_s29 = scalar_lea.vmem %s1523_s27, 64 }
  0x60   : > { %v828_v28 = vmul.f32 %v1864_v34, %v1864_v34  ;;  %1508 = vpow2.f32 %v779_v18  ;;  %v783_v31 = vmul.f32 1.442695, %v754_v19  ;;  %v829_v40 = vmul.f32 %v1873_v45, %v1873_v45  ;;  %v690_v34 = vld [vmem:[%s1782_s10 + $0x68] sm:$0xff]  ;;  %p1526_p2 = scmp.lt.s32.totalorder %s1524_s29, %s1518_s24 }
  0x61   : > { %870 = vadd.xlane.f32.xlu1 %v869_v14  ;;  %v1503_v20 = vpop.eup %1502  ;;  %v872_v33 = vsel %vm853_vm2, %v843_v22, 0.0  ;;  %1510 = vpow2.f32 %v781_v26  ;;  %v812_v41 = vadd.f32 %v796_v39, %v1841_v4  ;;  %v734_v42 = vmul.f32 %v718_v17, %v718_v17 }
  0x62   : > { %v797_v15 = vmul.f32 %v1503_v20, %v733_v6  ;;  %1512 = vpow2.f32 %v783_v31  ;;  %v755_v46 = vsub.f32 0.0, %v1911_v27  ;;  %v735_v25 = vmul.f32 %v719_v23, %v719_v23  ;;  %p1527_p3 = por %p1526_p2, %p1525_p1 }
  0x63   : > { %867 = vadd.xlane.f32.xlu0 %v866_v13  ;;  %v720_v48 = vsub.f32 %v672_v29, %v688_v30  ;;  %v756_v49 = vsub.f32 0.0, %v1918_v32  ;;  %v844_v45 = vsub.f32 %v812_v41, %v828_v28  ;;  %v721_v50 = vsub.f32 %v673_v35, %v689_v36 }
  0x64   : > { %v813_v24 = vadd.f32 %v797_v15, %v1850_v11  ;;  %v785_v60 = vmul.f32 1.442695, %v755_v46  ;;  %v830_v52 = vmul.f32 %v670_v1, %v670_v1  ;;  %v722_v53 = vsub.f32 %v674_v44, %v690_v34  ;;  %v692_v1 = vld [vmem:[%s1782_s10 + $0x78] sm:$0xff]  ;;  %p1528_p5 = pnand %p1527_p3, %p1521_p0 }
  0x65   : > { %v787_v54 = vmul.f32 1.442695, %v756_v49  ;;  %v1599_v37 = vmov 0   ;;  %v875_v55 = vsel %vm853_vm2, %v844_v45, 0.0  ;;  %v831_v2 = vmul.f32 %v671_v7, %v671_v7  ;;  %v562_v45 = vld [vmem:[#allocation2 + $0x10] sm:$0xff] }
  0x66   : > { %v1505_v51 = vpop.eup %1504  ;;  %v845_v4 = vsub.f32 %v813_v24, %v829_v40  ;;  %1420 = vset.pattern.permute.xlu0 %v1599_v37  ;;  %1421 = vset.pattern.permute.xlu1 %v1599_v37  ;;  %1514 = vpow2.f32 %v785_v60  ;;  %v736_v63 = vmul.f32 %v720_v48, %v720_v48  ;;  %v737_v12 = vmul.f32 %v721_v50, %v721_v50  ;;  %v560_v50 = vld [vmem:[#allocation2] sm:$0xff] }
  0x67   : > { %873 = vadd.xlane.f32.xlu0 %v872_v33  ;;  %v1507_v11 = vpop.eup %1506  ;;  %v798_v56 = vmul.f32 %v1505_v51, %v734_v42  ;;  %876 = vadd.xlane.f32.xlu1 %v875_v55  ;;  %1516 = vpow2.f32 %v787_v54  ;;  %v738_v8 = vmul.f32 %v722_v53, %v722_v53  ;;  %v723_v10 = vsub.f32 %v675_v58, %v691_v57  ;;  %v563_v53 = vld [vmem:[#allocation2 + $0x18] sm:$0xff]  ;;  %v565_v55 = vld [vmem:[#allocation2 + $0x28] sm:$0xff] }
  0x68   : > { %v878_v61 = vsel %vm853_vm2, %v845_v4, 0.0  ;;  %v799_v62 = vmul.f32 %v1507_v11, %v735_v25  ;;  %v724_v14 = vsub.f32 %v676_v0, %v692_v1  ;;  %v832_v18 = vmul.f32 %v672_v29, %v672_v29  ;;  %v566_v1 = vld [vmem:[#allocation2 + $0x30] sm:$0xff] }
  0x69   : > { %v814_v3 = vadd.f32 %v798_v56, %v1868_v38  ;;  %v833_v23 = vmul.f32 %v673_v35, %v673_v35  ;;  %v834_v26 = vmul.f32 %v674_v44, %v674_v44  ;;  %v739_v39 = vmul.f32 %v723_v10, %v723_v10 }
  0x6a   : > { %v815_v6 = vadd.f32 %v799_v62, %v1877_v47  ;;  %v1509_v7 = vpop.eup %1508  ;;  %v740_v30 = vmul.f32 %v724_v14, %v724_v14  ;;  %v835_v42 = vmul.f32 %v675_v58, %v675_v58  ;;  %v836_v34 = vmul.f32 %v676_v0, %v676_v0 }
  0x6b   : > { %879 = vadd.xlane.f32.xlu0 %v878_v61  ;;  %v846_v13 = vsub.f32 %v814_v3, %v830_v52  ;;  %v1511_v9 = vpop.eup %1510  ;;  %v800_v17 = vmul.f32 %v1509_v7, %v736_v63  ;;  %v567_v61 = vld [vmem:[#allocation2 + $0x38] sm:$0xff]  ;;  %vm1107_vm1 = vcmask 1048512  }
  0x6c   : > { %v847_v16 = vsub.f32 %v815_v6, %v831_v2  ;;  %v1513_v19 = vpop.eup %1512  ;;  %v801_v22 = vmul.f32 %v1511_v9, %v737_v12  ;;  %v564_v2 = vld [vmem:[#allocation2 + $0x20] sm:$0xff]  ;;  %v569_v6 = vld [vmem:[#allocation2 + $0x48] sm:$0xff] }
  0x6d   : > { %v881_v21 = vsel %vm853_vm2, %v846_v13, 0.0  ;;  %v816_v47 = vadd.f32 %v800_v17, %v1890_v59  ;;  %v802_v20 = vmul.f32 %v1513_v19, %v738_v8  ;;  %v568_v13 = vld [vmem:[#allocation2 + $0x40] sm:$0xff] }
  0x6e   : > { %882 = vadd.xlane.f32.xlu1 %v881_v21  ;;  %v884_v38 = vsel %vm853_vm2, %v847_v16, 0.0  ;;  %v817_v28 = vadd.f32 %v801_v22, %v1893_v43 }
  0x6f   : > { %885 = vadd.xlane.f32.xlu0 %v884_v38  ;;  %v848_v31 = vsub.f32 %v816_v47, %v832_v18  ;;  %v818_v29 = vadd.f32 %v802_v20, %v1900_v5  ;;  %v571_v18 = vld [vmem:[#allocation2 + $0x58] sm:$0xff] }
  0x70   : > { %v1515_v33 = vpop.eup %1514  ;;  %v849_v15 = vsub.f32 %v817_v28, %v833_v23  ;;  %v570_v23 = vld [vmem:[#allocation2 + $0x50] sm:$0xff]  ;;  %v998_v28 = vlaneseq }
  0x71   : > { %v1517_v40 = vpop.eup %1516  ;;  %v887_v35 = vsel %vm853_vm2, %v848_v31, 0.0  ;;  %v850_v36 = vsub.f32 %v818_v29, %v834_v26  ;;  %v803_v41 = vmul.f32 %v1515_v33, %v739_v39  ;;  %v573_v39 = vld [vmem:[#allocation2 + $0x68] sm:$0xff]  ;;  %v572_v33 = vld [vmem:[#allocation2 + $0x60] sm:$0xff] }
  0x72   : > { %888 = vadd.xlane.f32.xlu1 %v887_v35  ;;  %v890_v59 = vsel %vm853_vm2, %v849_v15, 0.0  ;;  %v804_v44 = vmul.f32 %v1517_v40, %v740_v30  ;;  %v1963_v15 = vand.u32 127, %v998_v28 }
  0x73   : > { %891 = vadd.xlane.f32.xlu0 %v890_v59  ;;  %v893_v43 = vsel %vm853_vm2, %v850_v36, 0.0  ;;  %v819_v46 = vadd.f32 %v803_v41, %v1911_v27  ;;  %v561_v27 = vld [vmem:[#allocation2 + $0x8] sm:$0xff]  ;;  %v1966_v59 = vshrl.u32 %v998_v28, 7 }
  0x74   : > { %v820_v5 = vadd.f32 %v804_v44, %v1918_v32  ;;  %v1004_v44 = vadd.s32 4294967288, %v1963_v15 }
  0x75   : > { %v851_v24 = vsub.f32 %v819_v46, %v835_v42  ;;  %v575_v46 = vld [vmem:[#allocation2 + $0x78] sm:$0xff] }
  0x76   : > { %894 = vadd.xlane.f32.xlu1 %v893_v43  ;;  %v852_v25 = vsub.f32 %v820_v5, %v836_v34  ;;  %v574_v34 = vld [vmem:[#allocation2 + $0x70] sm:$0xff] }
  0x77   : > { %v896_v48 = vsel %vm853_vm2, %v851_v24, 0.0  ;;  %v1971_v24 = vsub.s32 %v1004_v44, %v1966_v59 }
  0x78   : > { %897 = vadd.xlane.f32.xlu0 %v896_v48  ;;  %v899_v49 = vsel %vm853_vm2, %v852_v25, 0.0 }
  0x7a   : > { %900 = vadd.xlane.f32.xlu1 %v899_v49  ;;  %v1018_v49 = vadd.s32 4294967272, %v1963_v15 }
  0xbf   : > { %v585_v60 = vpop.xlane.xlu1 %584 }
  0xc0   : > { %v627_v51 = vadd.f32 %v585_v60, %v562_v45  ;;  %v579_v4 = vpop.xlane.xlu0 %578 }
  0xc1   : > { %v625_v52 = vadd.f32 %v579_v4, %v560_v50  ;;  %v1011_v4 = vadd.s32 4294967280, %v1963_v15 }
  0xc2   : > { %644 = vst.msk [vmem:[#allocation2 + $0x10] sm:$0xff] %vm351_vm0, %v627_v51  ;;  %v1977_v51 = vsub.s32 %v1963_v15, %v1966_v59 }
  0xc3   : > { %642 = vst.msk [vmem:[#allocation2] sm:$0xff] %vm351_vm0, %v625_v52  ;;  %v588_v32 = vpop.xlane.xlu1 %587 }
  0xc4   : > { %v628_v54 = vadd.f32 %v588_v32, %v563_v53  ;;  %v582_v37 = vpop.xlane.xlu0 %581 }
  0xc5   : > { %v626_v11 = vadd.f32 %v582_v37, %v561_v27 }
  0xc6   : > { %645 = vst.msk [vmem:[#allocation2 + $0x18] sm:$0xff] %vm351_vm0, %v628_v54  ;;  %v1983_v54 = vsub.s32 %v1018_v49, %v1966_v59 }
  0xc7   : > { %643 = vst.msk [vmem:[#allocation2 + $0x8] sm:$0xff] %vm351_vm0, %v626_v11  ;;  %v594_v56 = vpop.xlane.xlu1 %593 }
  0xc8   : > { %v630_v58 = vadd.f32 %v594_v56, %v565_v55  ;;  %v1987_v55 = vsub.s32 %v1011_v4, %v1966_v59 }
  0xc9   : > { %v591_v57 = vpop.xlane.xlu0 %590  ;;  %v920_v9 = vld [vmem:[#allocation2 + $0x10] sm:$0xff] }
  0xca   : > { %647 = vst.msk [vmem:[#allocation2 + $0x28] sm:$0xff] %vm351_vm0, %v630_v58  ;;  %v629_v62 = vadd.f32 %v591_v57, %v564_v2  ;;  %v918_v63 = vld [vmem:[#allocation2] sm:$0xff]  ;;  %v1025_v2 = vadd.s32 4294967264, %v1963_v15  ;;  %v1032_v57 = vadd.s32 4294967256, %v1963_v15 }
  0xcb   : > { %951 = vperm.xlu0 %1420, %v918_v63   ;;  %v600_v0 = vpop.xlane.xlu1 %599 }
  0xcc   : > { %646 = vst.msk [vmem:[#allocation2 + $0x20] sm:$0xff] %vm351_vm0, %v629_v62  ;;  %v632_v3 = vadd.f32 %v600_v0, %v567_v61 }
  0xcd   : > { %v597_v12 = vpop.xlane.xlu0 %596  ;;  %v921_v21 = vld [vmem:[#allocation2 + $0x18] sm:$0xff] }
  0xce   : > { %649 = vst.msk [vmem:[#allocation2 + $0x38] sm:$0xff] %vm351_vm0, %v632_v3  ;;  %v631_v8 = vadd.f32 %v597_v12, %v566_v1  ;;  %v919_v10 = vld [vmem:[#allocation2 + $0x8] sm:$0xff]  ;;  %v1995_v3 = vsub.s32 %v1025_v2, %v1966_v59 }
  0xcf   : > { %954 = vperm.xlu1 %1421, %v919_v10   ;;  %v606_v7 = vpop.xlane.xlu1 %605  ;;  %v1999_v10 = vsub.s32 %v1032_v57, %v1966_v59 }
  0xd0   : > { %648 = vst.msk [vmem:[#allocation2 + $0x30] sm:$0xff] %vm351_vm0, %v631_v8  ;;  %v634_v14 = vadd.f32 %v606_v7, %v569_v6  ;;  %v1039_v6 = vadd.s32 4294967248, %v1963_v15 }
  0xd1   : > { %v603_v16 = vpop.xlane.xlu0 %602  ;;  %v923_v31 = vld [vmem:[#allocation2 + $0x28] sm:$0xff] }
  0xd2   : > { %651 = vst.msk [vmem:[#allocation2 + $0x48] sm:$0xff] %vm351_vm0, %v634_v14  ;;  %v633_v17 = vadd.f32 %v603_v16, %v568_v13 }
  0xd3   : > { %957 = vperm.xlu1 %1421, %v920_v9   ;;  %v922_v38 = vld [vmem:[#allocation2 + $0x20] sm:$0xff] }
  0xd4   : > { %650 = vst.msk [vmem:[#allocation2 + $0x40] sm:$0xff] %vm351_vm0, %v633_v17  ;;  %v612_v19 = vpop.xlane.xlu1 %611 }
  0xd5   : > { %v636_v22 = vadd.f32 %v612_v19, %v571_v18  ;;  %v925_v50 = vld [vmem:[#allocation2 + $0x38] sm:$0xff]  ;;  %v1046_v18 = vadd.s32 4294967240, %v1963_v15 }
  0xd7   : > { %653 = vst.msk [vmem:[#allocation2 + $0x58] sm:$0xff] %vm351_vm0, %v636_v22  ;;  %960 = vperm.xlu1 %1421, %v921_v21   ;;  %v924_v41 = vld [vmem:[#allocation2 + $0x30] sm:$0xff]  ;;  %v2006_v21 = vsub.s32 %v1039_v6, %v1966_v59 }
  0xd8   : > { %v609_v26 = vpop.xlane.xlu0 %608 }
  0xd9   : > { %v635_v47 = vadd.f32 %v609_v26, %v570_v23  ;;  %v927_v20 = vld [vmem:[#allocation2 + $0x48] sm:$0xff] }
  0xda   : > { %978 = vperm.xlu0 %1420, %v927_v20   ;;  %v1053_v20 = vadd.s32 4294967232, %v1963_v15 }
  0xdb   : > { %652 = vst.msk [vmem:[#allocation2 + $0x50] sm:$0xff] %vm351_vm0, %v635_v47  ;;  %963 = vperm.xlu1 %1421, %v922_v38   ;;  %v926_v53 = vld [vmem:[#allocation2 + $0x40] sm:$0xff] }
  0xdc   : > { %v618_v30 = vpop.xlane.xlu1 %617 }
  0xdd   : > { %v638_v29 = vadd.f32 %v618_v30, %v573_v39  ;;  %v2012_v39 = vsub.s32 %v1046_v18, %v1966_v59 }
  0xde   : > { %v929_v40 = vld [vmem:[#allocation2 + $0x58] sm:$0xff] }
  0xdf   : > { %655 = vst.msk [vmem:[#allocation2 + $0x68] sm:$0xff] %vm351_vm0, %v638_v29  ;;  %966 = vperm.xlu1 %1421, %v923_v31   ;;  %984 = vperm.xlu0 %1420, %v929_v40   ;;  %v1060_v40 = vadd.s32 4294967224, %v1963_v15 }
  0xe0   : > { %v615_v35 = vpop.xlane.xlu0 %614  ;;  %v859_v36 = vpop.xlane.xlu1 %858 }
  0xe1   : > { %v637_v42 = vadd.f32 %v615_v35, %v572_v33  ;;  %v903_v25 = vmul.f32 0.5, %v859_v36  ;;  %v2018_v35 = vsub.s32 %v1053_v20, %v1966_v59 }
  0xe2   : > { %v928_v61 = vld [vmem:[#allocation2 + $0x50] sm:$0xff] }
  0xe3   : > { %654 = vst.msk [vmem:[#allocation2 + $0x60] sm:$0xff] %vm351_vm0, %v637_v42  ;;  %969 = vperm.xlu1 %1421, %v924_v41   ;;  %v1134_v32 = vrot.slane %v903_v25, %v1971_v24  ;;  %v1067_v41 = vadd.s32 4294967216, %v1963_v15  ;;  %v1074_v25 = vadd.s32 4294967208, %v1963_v15 }
  0xe4   : > { %v621_v43 = vpop.xlane.xlu0 %620 }
  0xe5   : > { %v639_v5 = vadd.f32 %v621_v43, %v574_v34  ;;  %v2024_v34 = vsub.s32 %v1060_v40, %v1966_v59 }
  0xe6   : > { %v624_v48 = vpop.xlane.xlu1 %623  ;;  %v931_v45 = vld [vmem:[#allocation2 + $0x68] sm:$0xff] }
  0xe7   : > { %656 = vst.msk [vmem:[#allocation2 + $0x70] sm:$0xff] %vm351_vm0, %v639_v5  ;;  %v640_v60 = vadd.f32 %v624_v48, %v575_v46  ;;  %990 = vperm.xlu0 %1420, %v931_v45   ;;  %972 = vperm.xlu1 %1421, %v925_v50   ;;  %v2028_v5 = vsub.s32 %v1067_v41, %v1966_v59  ;;  %v1081_v50 = vadd.s32 4294967200, %v1963_v15 }
  0xe8   : > { %v856_v52 = vpop.xlane.xlu0 %855 }
  0xe9   : > { %657 = vst.msk [vmem:[#allocation2 + $0x78] sm:$0xff] %vm351_vm0, %v640_v60  ;;  %v902_v27 = vmul.f32 0.5, %v856_v52  ;;  %vm1100_vm0 = vcmask 982912  }
  0xea   : > { %v865_v37 = vpop.xlane.xlu1 %864  ;;  %v930_v14 = vld [vmem:[#allocation2 + $0x60] sm:$0xff] }
  0xeb   : > { %v1130_v11 = vrot.slane %v902_v27, %v1977_v51  ;;  %v905_v56 = vmul.f32 0.5, %v865_v37  ;;  %975 = vperm.xlu1 %1421, %v926_v53   ;;  %v2037_v27 = vsub.s32 %v1074_v25, %v1966_v59 }
  0xec   : > { %v862_v58 = vpop.xlane.xlu0 %861 }
  0xed   : > { %v904_v62 = vmul.f32 0.5, %v862_v58  ;;  %v1135_v63 = vsel %vm1009_vm3, %v1134_v32, %v1130_v11  ;;  %v1144_v0 = vrot.slane %v905_v56, %v1983_v54  ;;  %v1088_v32 = vadd.s32 4294967192, %v1963_v15 }
  0xee   : > { %v871_v12 = vpop.xlane.xlu1 %870  ;;  %v932_v26 = vld [vmem:[#allocation2 + $0x70] sm:$0xff]  ;;  %v2041_v11 = vsub.s32 %v1081_v50, %v1966_v59  ;;  %v1095_v58 = vadd.s32 4294967184, %v1963_v15 }
  0xef   : > { %v1139_v1 = vrot.slane %v904_v62, %v1987_v55  ;;  %981 = vperm.xlu1 %1421, %v928_v61   ;;  %v907_v7 = vmul.f32 0.5, %v871_v12 }
  0xf0   : > { %v868_v8 = vpop.xlane.xlu0 %867  ;;  %v933_v13 = vld [vmem:[#allocation2 + $0x78] sm:$0xff] }
  0xf1   : > { %v1140_v9 = vsel %vm1016_vm4, %v1139_v1, %v1135_v63  ;;  %v906_v16 = vmul.f32 0.5, %v868_v8  ;;  %996 = vperm.xlu0 %1420, %v933_v13   ;;  %v1154_v22 = vrot.slane %v907_v7, %v1999_v10  ;;  %v1102_v1 = vadd.s32 4294967176, %v1963_v15 }
  0xf2   : > { %v1145_v17 = vsel %vm1023_vm5, %v1144_v0, %v1140_v9  ;;  %v2048_v0 = vsub.s32 %v1088_v32, %v1966_v59  ;;  %v2053_v7 = vsub.s32 %v1095_v58, %v1966_v59 }
  0xf3   : > { %v1149_v19 = vrot.slane %v906_v16, %v1995_v3  ;;  %987 = vperm.xlu1 %1421, %v930_v14   ;;  %v2060_v15 = vsub.s32 %v1102_v1, %v1966_v59 }
  0xf4   : > { %v874_v23 = vpop.xlane.xlu0 %873  ;;  %v877_v30 = vpop.xlane.xlu1 %876 }
  0xf5   : > { %v1150_v38 = vsel %vm1030_vm6, %v1149_v19, %v1145_v17  ;;  %v908_v47 = vmul.f32 0.5, %v874_v23  ;;  %v909_v29 = vmul.f32 0.5, %v877_v30 }
  0xf6   : > { %v1155_v31 = vsel %vm1037_vm7, %v1154_v22, %v1150_v38 }
  0xf7   : > { %v1159_v28 = vrot.slane %v908_v47, %v2006_v21  ;;  %993 = vperm.xlu1 %1421, %v932_v26   ;;  %v1164_v42 = vrot.slane %v909_v29, %v2012_v39 }
  0xf8   : > { %v880_v33 = vpop.xlane.xlu0 %879 }
  0xf9   : > { %v910_v36 = vmul.f32 0.5, %v880_v33  ;;  %v1160_v44 = vsel %vm1044_vm8, %v1159_v28, %v1155_v31 }
  0xfa   : > { %v1165_v48 = vsel %vm1051_vm9, %v1164_v42, %v1160_v44 }
  0xfb   : > { %v1169_v43 = vrot.slane %v910_v36, %v2018_v35  ;;  %v883_v46 = vpop.xlane.xlu1 %882 }
  0xfc   : > { %v911_v49 = vmul.f32 0.5, %v883_v46  ;;  %v886_v45 = vpop.xlane.xlu0 %885 }
  0xfd   : > { %v912_v60 = vmul.f32 0.5, %v886_v45  ;;  %v1170_v52 = vsel %vm1058_vm10, %v1169_v43, %v1165_v48 }
  0xfe   : > { %v1174_v4 = vrot.slane %v911_v49, %v2024_v34 }
  0xff   : > { %v1179_v53 = vrot.slane %v912_v60, %v2028_v5  ;;  %v889_v37 = vpop.xlane.xlu1 %888 }
 0x100   : > { %v913_v56 = vmul.f32 0.5, %v889_v37  ;;  %v892_v2 = vpop.xlane.xlu0 %891  ;;  %v1175_v57 = vsel %vm1065_vm11, %v1174_v4, %v1170_v52 }
 0x101   : > { %v914_v61 = vmul.f32 0.5, %v892_v2  ;;  %v1180_v62 = vsel %vm1072_vm12, %v1179_v53, %v1175_v57 }
 0x102   : > { %v1184_v63 = vrot.slane %v913_v56, %v2037_v27 }
 0x103   : > { %v1189_v12 = vrot.slane %v914_v61, %v2041_v11  ;;  %v895_v6 = vpop.xlane.xlu1 %894 }
 0x104   : > { %v915_v8 = vmul.f32 0.5, %v895_v6  ;;  %v1185_v13 = vsel %vm1079_vm13, %v1184_v63, %v1180_v62 }
 0x105   : > { %v898_v14 = vpop.xlane.xlu0 %897  ;;  %v1190_v9 = vsel %vm1086_vm14, %v1189_v12, %v1185_v13 }
 0x106   : > { %v1194_v16 = vrot.slane %v915_v8, %v2048_v0  ;;  %v916_v17 = vmul.f32 0.5, %v898_v14 }
 0x107   : > { %v901_v18 = vpop.xlane.xlu1 %900 }
 0x108   : > { %v1199_v19 = vrot.slane %v916_v17, %v2053_v7  ;;  %v917_v22 = vmul.f32 0.5, %v901_v18  ;;  %v1195_v23 = vsel %vm1093_vm15, %v1194_v16, %v1190_v9 }
 0x10a   : > { %v1200_v26 = vsel %vm1100_vm0, %v1199_v19, %v1195_v23  ;;  %v1204_v38 = vrot.slane %v917_v22, %v2060_v15 }
 0x10c   : > { %v1205_v47 = vsel %vm1107_vm1, %v1204_v38, %v1200_v26 }
 0x10d   : > { %1207 = vst [vmem:[%s2069_s12 + $0x1] sm:$0x1] %v1205_v47 }
 0x14a   : > { %v952_v29 = vpop.permute.xlu0 %951 }
 0x14b   : > { %v1003_v42 = vrot.slane %v952_v29, %v1977_v51 }
 0x14e   : > { %v955_v59 = vpop.permute.xlu1 %954 }
 0x14f   : > { %v1008_v33 = vrot.slane %v955_v59, %v1971_v24 }
 0x151   : > { %v1010_v46 = vsel %vm1009_vm3, %v1008_v33, %v1003_v42 }
 0x152   : > { %v958_v20 = vpop.permute.xlu1 %957 }
 0x153   : > { %v1015_v36 = vrot.slane %v958_v20, %v1987_v55 }
 0x155   : > { %v1017_v49 = vsel %vm1016_vm4, %v1015_v36, %v1010_v46 }
 0x156   : > { %v961_v28 = vpop.permute.xlu1 %960 }
 0x157   : > { %v1022_v44 = vrot.slane %v961_v28, %v1983_v54 }
 0x159   : > { %v979_v41 = vpop.permute.xlu0 %978  ;;  %v1024_v24 = vsel %vm1023_vm5, %v1022_v44, %v1017_v49 }
 0x15a   : > { %v964_v30 = vpop.permute.xlu1 %963 }
 0x15b   : > { %v1029_v43 = vrot.slane %v964_v30, %v1995_v3 }
 0x15d   : > { %v1031_v50 = vsel %vm1030_vm6, %v1029_v43, %v1024_v24 }
 0x15e   : > { %v967_v31 = vpop.permute.xlu1 %966  ;;  %v985_v51 = vpop.permute.xlu0 %984 }
 0x15f   : > { %v1036_v25 = vrot.slane %v967_v31, %v1999_v10  ;;  %v1078_v2 = vrot.slane %v985_v51, %v2037_v27 }
 0x161   : > { %v1038_v54 = vsel %vm1037_vm7, %v1036_v25, %v1031_v50 }
 0x162   : > { %v970_v40 = vpop.permute.xlu1 %969 }
 0x163   : > { %v1043_v45 = vrot.slane %v970_v40, %v2006_v21  ;;  %v1064_v21 = vrot.slane %v979_v41, %v2024_v34 }
 0x165   : > { %v1045_v3 = vsel %vm1044_vm8, %v1043_v45, %v1038_v54 }
 0x166   : > { %v973_v48 = vpop.permute.xlu1 %972 }
 0x167   : > { %v1050_v55 = vrot.slane %v973_v48, %v2012_v39  ;;  %v991_v39 = vpop.permute.xlu0 %990 }
 0x168   : > { %v1092_v62 = vrot.slane %v991_v39, %v2048_v0 }
 0x169   : > { %v1052_v10 = vsel %vm1051_vm9, %v1050_v55, %v1045_v3 }
 0x16a   : > { %v976_v60 = vpop.permute.xlu1 %975 }
 0x16b   : > { %v1057_v4 = vrot.slane %v976_v60, %v2018_v35 }
 0x16d   : > { %v1059_v52 = vsel %vm1058_vm10, %v1057_v4, %v1052_v10 }
 0x16e   : > { %v982_v53 = vpop.permute.xlu1 %981  ;;  %v1066_v37 = vsel %vm1065_vm11, %v1064_v21, %v1059_v52 }
 0x16f   : > { %v1071_v32 = vrot.slane %v982_v53, %v2028_v5 }
 0x170   : > { %v997_v61 = vpop.permute.xlu0 %996 }
 0x171   : > { %v1073_v56 = vsel %vm1072_vm12, %v1071_v32, %v1066_v37  ;;  %v1106_v27 = vrot.slane %v997_v61, %v2060_v15 }
 0x172   : > { %v988_v58 = vpop.permute.xlu1 %987  ;;  %v1080_v57 = vsel %vm1079_vm13, %v1078_v2, %v1073_v56 }
 0x173   : > { %v1085_v35 = vrot.slane %v988_v58, %v2041_v11 }
 0x175   : > { %v1087_v34 = vsel %vm1086_vm14, %v1085_v35, %v1080_v57 }
 0x176   : > { %v994_v5 = vpop.permute.xlu1 %993  ;;  %v1094_v1 = vsel %vm1093_vm15, %v1092_v62, %v1087_v34 }
 0x177   : > { %v1099_v63 = vrot.slane %v994_v5, %v2053_v7 }
 0x179   : > { %v1101_v11 = vsel %vm1100_vm0, %v1099_v63, %v1094_v1 }
 0x17a   : > { %v1108_v0 = vsel %vm1107_vm1, %v1106_v27, %v1101_v11 }
 0x17b   : > { %1110 = vst [vmem:[%s2069_s12] sm:$0x1] %v1108_v0 }
 0x17c   : > { %1531 = shalt.err (!%p1528_p5)
}
 0x17d   : > { %s1532_s7 = scalar_lea.hbm %s2107_s17, 32  ;;  %s1536_s9 = scalar_lea.hbm %s2163_s5, 64 }
 0x17e   : > { %p1533_p6 = scmp.ne.s32.totalorder %s2107_s17, %s1532_s7  ;;  %p1537_p10 = scmp.lt.u32.totalorder %s2107_s17, %s2163_s5 }
 0x17f   : > { %p1538_p11 = scmp.lt.u32.totalorder %s1536_s9, %s1532_s7  ;;  %p1540_p13 = scmp.lt.u32.totalorder %s1532_s7, %s2107_s17 }
 0x180   : > { %p1534_p7 = pnand %p1533_p6, %p1671_p4 }
 0x181   : > { %p1539_p12 = por %p1538_p11, %p1537_p10 }
 0x182   : > { %p1535_p9 = pneg %p1534_p7 }
 0x183   : > { %p1541_p0 = por %p1540_p13, %p1539_p12 }
 0x185   : > { %p1542_p1 = pnand %p1541_p0, %p1535_p9 }
 0x187   : > { %1545 = shalt.err (!%p1542_p1)
}
 0x188   : > { %1363 = dma.vmem_to_hbm [thread:$0]  (%p1671_p4), %s2109_s14, 32, %s2107_s17, %s1209_s21  }
 0x189 PF: > { %p1369_p2 = scmp.ge.s32.totalorder %s1596_s23, 2  ;;  %s1234_s13 = sand.u32 1, %s1576_s18  }
 0x18a   : > { %s1235_s15 = scalar_lea.sflag [#allocation4], %s1234_s13 }
 0x18b   : > { %p1366_p3 = pnand %p1369_p2, %p1678_p8 }
 0x18d   : > { %1571 = dma.done.wait (!%p1366_p3), %s1235_s15, 32  }
 0x18e   : > { %1573 = vsyncadd (!%p1366_p3), %s1235_s15, 4294967264  ;;  %s18_s23 = sadd.s32 1, %s1596_s23   ;;  %s2167_s18 = smov %s1580_s19 }
 0x18f   : > { %p15_p5 = scmp.ge.s32.totalorder %s18_s23, 4   ;;  %s2168_s19 = smov %s1584_s20 }
 0x190   : > { %s2169_s20 = smov %s1684_s6  ;;  %s2170_s21 = smov %s1592_s22 }
 0x191   : > { %s2171_s22 = smov %s2173_s26  ;;  %17 = sbr.rel (!%p15_p5) target bundleno = 4 (0x4), region = 95 }
 0x198   :  { %1240 = vsyncpa [#allocation4], 1 }
 0x199   :  { %1242 = vsyncpa [#allocation4 + $0x1], 1 }

</bundles_post_ra>
